<compile_context>
chip_gen: v7x
topology: tpu7x:2x2x1
jax: 0.10.0
libtpu: 0.0.40
codegen_flags: <defaults>
</compile_context>

<pallas_src>
import functools

import jax
import jax.numpy as jnp
from jax.experimental import pallas as pl
from jax.experimental.pallas import tpu as pltpu


# ----------------------------------------------------------------------------
# Pallas kernel: complex channel contraction + ProductPath, modes on lanes.
#   x_ref : (2, B, Ci,  TM)   [0]=real, [1]=imag
#   w_ref : (2, Ci, Co1, TM)
#   o_ref : (2, B, Co,  TM)   Co = Co1 + num_prod
# ----------------------------------------------------------------------------
def _spectral_prod_kernel(Ci, Co1, num_prod, x_ref, w_ref, o_ref):
    # Load each component once as a dense slab (modes dense on lanes).
    xr = x_ref[0]                       # (B, Ci, TM)
    xi = x_ref[1]
    wr = w_ref[0]                       # (Ci, Co1, TM)
    wi = w_ref[1]

    B = xr.shape[0]
    TM = xr.shape[-1]

    # Complex contraction over input channels, vectorized across (B, Co1, TM)
    # on the VPU; statically unrolled over the tiny Ci axis.
    yr = jnp.zeros((B, Co1, TM), jnp.float32)
    yi = jnp.zeros((B, Co1, TM), jnp.float32)
    for i in range(Ci):
        xri = xr[:, i:i + 1, :]         # (B, 1, TM)  broadcast over output channels
        xii = xi[:, i:i + 1, :]
        wri = wr[i][None, :, :]         # (1, Co1, TM) broadcast over batch
        wii = wi[i][None, :, :]
        yr = yr + xri * wri - xii * wii
        yi = yi + xri * wii + xii * wri

    # Linear channels: one dense slice store per component.
    o_ref[0, :, :Co1, :] = yr
    o_ref[1, :, :Co1, :] = yi

    # ProductPath: complex products of consecutive linear channel pairs.
    if num_prod > 0:
        pr, pi = [], []
        for j in range(num_prod):
            ar, ai = yr[:, 2 * j, :], yi[:, 2 * j, :]
            br, bi = yr[:, 2 * j + 1, :], yi[:, 2 * j + 1, :]
            pr.append(ar * br - ai * bi)
            pi.append(ar * bi + ai * br)
        o_ref[0, :, Co1:, :] = jnp.stack(pr, axis=1)   # (B, num_prod, TM)
        o_ref[1, :, Co1:, :] = jnp.stack(pi, axis=1)


# ----------------------------------------------------------------------------
# Wrapper: FFT glue + mode-last packing + pallas_call + scatter back + iFFT.
# ----------------------------------------------------------------------------
def spectral_conv_prod2d(x, w1, w2, modes1, modes2, num_prod):
    # TODO(synk): rfft2 / irfft2 have no Pallas TPU equivalent; done in plain JAX.
    B, Ci, H, W = x.shape
    Wf = W // 2 + 1
    Co1 = w1.shape[1]              # out_channels - num_prod (linear channels)
    Co = Co1 + num_prod            # out_channels
    m1, m2 = modes1, modes2
    Mh = m1 * m2
    M = 2 * Mh                     # retained modes (top + bottom blocks)
    assert 2 * num_prod <= Co1, "ProductPath needs 2*num_prod <= out_channels - num_prod"

    x_ft = jnp.fft.rfft2(x)                                    # (B, Ci, H, Wf) complex64
    top = x_ft[:, :, :m1, :m2]                                 # (B, Ci, m1, m2)
    bot = x_ft[:, :, H - m1:, :m2]

    # Mode-last packing: modes on the lane axis.
    x_modes = jnp.concatenate([top.reshape(B, Ci, Mh),
                               bot.reshape(B, Ci, Mh)], axis=-1)          # (B, Ci, M) c64
    w_modes = jnp.concatenate([w1.reshape(Ci, Co1, Mh),
                               w2.reshape(Ci, Co1, Mh)], axis=-1)         # (Ci, Co1, M) c64

    # Pad the mode (lane) axis to a multiple of 128: every in-kernel access is
    # then a dense, unmasked 128-lane vld/vst (padded modes are zeros; they
    # contribute zeros through both the linear and product paths).
    Mp = ((M + 127) // 128) * 128
    if Mp != M:
        pad = [(0, 0), (0, 0), (0, Mp - M)]
        x_modes = jnp.pad(x_modes, pad)
        w_modes = jnp.pad(w_modes, pad)

    x_ri = jnp.stack([jnp.real(x_modes), jnp.imag(x_modes)], axis=0).astype(jnp.float32)
    w_ri = jnp.stack([jnp.real(w_modes), jnp.imag(w_modes)], axis=0).astype(jnp.float32)

    # One mode block when the whole problem fits trivially in VMEM (it does
    # here: ~20 KB); split the lane axis only for large M so the grid axis can
    # be shared across TensorCores.
    if Mp > 1024 and Mp % 256 == 0:
        TM = Mp // 2
    else:
        TM = Mp
    NB = Mp // TM

    kernel = functools.partial(_spectral_prod_kernel, Ci, Co1, num_prod)
    o_ri = pl.pallas_call(
        kernel,
        out_shape=jax.ShapeDtypeStruct((2, B, Co, Mp), jnp.float32),
        grid=(NB,),
        in_specs=[
            pl.BlockSpec((2, B, Ci, TM), lambda g: (0, 0, 0, g)),
            pl.BlockSpec((2, Ci, Co1, TM), lambda g: (0, 0, 0, g)),
        ],
        out_specs=pl.BlockSpec((2, B, Co, TM), lambda g: (0, 0, 0, g)),
        compiler_params=pltpu.CompilerParams(dimension_semantics=("parallel",)),
    )(x_ri, w_ri)

    out = (o_ri[0] + 1j * o_ri[1]).astype(jnp.complex64)[:, :, :M]        # (B, Co, M)
    top_out = out[:, :, :Mh].reshape(B, Co, m1, m2)
    bot_out = out[:, :, Mh:].reshape(B, Co, m1, m2)

    out_ft = jnp.zeros((B, Co, H, Wf), dtype=jnp.complex64)
    out_ft = out_ft.at[:, :, :m1, :m2].set(top_out)
    out_ft = out_ft.at[:, :, H - m1:, :m2].set(bot_out)
    return jnp.fft.irfft2(out_ft, s=(H, W))                    # (B, Co, H, W) float32


# ----------------------------------------------------------------------------
# Pure-JAX reference (mirrors the PyTorch forward)
# ----------------------------------------------------------------------------
def reference(x, w1, w2, modes1, modes2, num_prod):
    B, Ci, H, W = x.shape
    Co1 = w1.shape[1]
    x_ft = jnp.fft.rfft2(x)
    out_ft = jnp.zeros((B, Co1, H, W // 2 + 1), jnp.complex64)
    out_ft = out_ft.at[:, :, :modes1, :modes2].set(
        jnp.einsum('bixy,ioxy->boxy', x_ft[:, :, :modes1, :modes2], w1))
    out_ft = out_ft.at[:, :, H - modes1:, :modes2].set(
        jnp.einsum('bixy,ioxy->boxy', x_ft[:, :, H - modes1:, :modes2], w2))
    prod = jnp.stack([out_ft[:, 2 * i] * out_ft[:, 2 * i + 1] for i in range(num_prod)], axis=1)
    out_ft = jnp.concatenate([out_ft, prod], axis=1)
    return jnp.fft.irfft2(out_ft, s=(H, W))


if __name__ == "__main__":
    # Module hyperparameters (small, consistent with __init__ asserts)
    in_channels, out_channels = 4, 6
    modes1, modes2 = 8, 8
    num_prod = 2
    Co1 = out_channels - num_prod
    B, H, W = 2, 16, 16

    key = jax.random.PRNGKey(0)
    kx, k1r, k1i, k2r, k2i = jax.random.split(key, 5)
    scale = 1.0 / (in_channels * out_channels)

    # weights ~ scale * Uniform[0,1) on real & imag (torch.rand on cfloat)
    w1 = (scale * jax.random.uniform(k1r, (in_channels, Co1, modes1, modes2), jnp.float32)
          + 1j * scale * jax.random.uniform(k1i, (in_channels, Co1, modes1, modes2), jnp.float32)
          ).astype(jnp.complex64)
    w2 = (scale * jax.random.uniform(k2r, (in_channels, Co1, modes1, modes2), jnp.float32)
          + 1j * scale * jax.random.uniform(k2i, (in_channels, Co1, modes1, modes2), jnp.float32)
          ).astype(jnp.complex64)

    x = jax.random.normal(kx, (B, in_channels, H, W), jnp.float32)

    fwd = jax.jit(functools.partial(spectral_conv_prod2d,
                                    modes1=modes1, modes2=modes2, num_prod=num_prod))
    y = fwd(x, w1, w2)
    y = jax.block_until_ready(y)

    y_ref = reference(x, w1, w2, modes1, modes2, num_prod)
    assert y.shape == (B, out_channels, H, W)
    assert jnp.allclose(y, y_ref, atol=2e-2, rtol=2e-2)

    print("KERNEL_OK")
</pallas_src>

<mosaic_0001>
module attributes {stable_mosaic.version = 11 : i64} {
  func.func @_spectral_prod_kernel(%arg0: i32, %arg1: memref<2x2x4x128xf32, #tpu.memory_space<vmem>>, %arg2: memref<2x4x4x128xf32, #tpu.memory_space<vmem>>, %arg3: memref<2x2x6x128xf32, #tpu.memory_space<vmem>>) attributes {dimension_semantics = [#tpu.dimension_semantics<parallel>], iteration_bounds = array<i64: 1>, scalar_prefetch = 0 : i64, scratch_operands = 0 : i64, tpu.core_type = #tpu.core_type<tc>, window_params = [{transform_indices = @transform_0, window_bounds = array<i64: 2, 2, 4, 128>}, {transform_indices = @transform_1, window_bounds = array<i64: 2, 4, 4, 128>}, {transform_indices = @transform_2, window_bounds = array<i64: 2, 2, 6, 128>}]} {
    %c0 = arith.constant 0 : index
    %c0_0 = arith.constant 0 : index
    %c0_1 = arith.constant 0 : index
    %c0_2 = arith.constant 0 : index
    %0 = vector.load %arg1[%c0, %c0_0, %c0_1, %c0_2] : memref<2x2x4x128xf32, #tpu.memory_space<vmem>>, vector<1x2x4x128xf32>
    %1 = vector.shape_cast %0 : vector<1x2x4x128xf32> to vector<2x4x128xf32>
    %c1 = arith.constant 1 : index
    %c0_3 = arith.constant 0 : index
    %c0_4 = arith.constant 0 : index
    %c0_5 = arith.constant 0 : index
    %2 = vector.load %arg1[%c1, %c0_3, %c0_4, %c0_5] : memref<2x2x4x128xf32, #tpu.memory_space<vmem>>, vector<1x2x4x128xf32>
    %3 = vector.shape_cast %2 : vector<1x2x4x128xf32> to vector<2x4x128xf32>
    %c0_6 = arith.constant 0 : index
    %c0_7 = arith.constant 0 : index
    %c0_8 = arith.constant 0 : index
    %c0_9 = arith.constant 0 : index
    %4 = vector.load %arg2[%c0_6, %c0_7, %c0_8, %c0_9] : memref<2x4x4x128xf32, #tpu.memory_space<vmem>>, vector<1x4x4x128xf32>
    %5 = vector.shape_cast %4 : vector<1x4x4x128xf32> to vector<4x4x128xf32>
    %c1_10 = arith.constant 1 : index
    %c0_11 = arith.constant 0 : index
    %c0_12 = arith.constant 0 : index
    %c0_13 = arith.constant 0 : index
    %6 = vector.load %arg2[%c1_10, %c0_11, %c0_12, %c0_13] : memref<2x4x4x128xf32, #tpu.memory_space<vmem>>, vector<1x4x4x128xf32>
    %7 = vector.shape_cast %6 : vector<1x4x4x128xf32> to vector<4x4x128xf32>
    %cst = arith.constant 0.000000e+00 : f32
    %8 = vector.broadcast %cst : f32 to vector<2x4x128xf32>
    %cst_14 = arith.constant 0.000000e+00 : f32
    %9 = vector.broadcast %cst_14 : f32 to vector<2x4x128xf32>
    %10 = vector.extract_strided_slice %1 {offsets = [0, 0, 0], sizes = [2, 1, 128], strides = [1, 1, 1]} : vector<2x4x128xf32> to vector<2x1x128xf32>
    %11 = vector.extract_strided_slice %3 {offsets = [0, 0, 0], sizes = [2, 1, 128], strides = [1, 1, 1]} : vector<2x4x128xf32> to vector<2x1x128xf32>
    %12 = vector.extract_strided_slice %5 {offsets = [0, 0, 0], sizes = [1, 4, 128], strides = [1, 1, 1]} : vector<4x4x128xf32> to vector<1x4x128xf32>
    %13 = vector.shape_cast %12 : vector<1x4x128xf32> to vector<4x128xf32>
    %14 = vector.shape_cast %13 : vector<4x128xf32> to vector<1x4x128xf32>
    %15 = vector.extract_strided_slice %7 {offsets = [0, 0, 0], sizes = [1, 4, 128], strides = [1, 1, 1]} : vector<4x4x128xf32> to vector<1x4x128xf32>
    %16 = vector.shape_cast %15 : vector<1x4x128xf32> to vector<4x128xf32>
    %17 = vector.shape_cast %16 : vector<4x128xf32> to vector<1x4x128xf32>
    %18 = vector.broadcast %10 : vector<2x1x128xf32> to vector<2x4x128xf32>
    %19 = vector.broadcast %14 : vector<1x4x128xf32> to vector<2x4x128xf32>
    %20 = arith.mulf %18, %19 : vector<2x4x128xf32>
    %21 = arith.addf %8, %20 : vector<2x4x128xf32>
    %22 = vector.broadcast %11 : vector<2x1x128xf32> to vector<2x4x128xf32>
    %23 = vector.broadcast %17 : vector<1x4x128xf32> to vector<2x4x128xf32>
    %24 = arith.mulf %22, %23 : vector<2x4x128xf32>
    %25 = arith.subf %21, %24 : vector<2x4x128xf32>
    %26 = vector.broadcast %10 : vector<2x1x128xf32> to vector<2x4x128xf32>
    %27 = vector.broadcast %17 : vector<1x4x128xf32> to vector<2x4x128xf32>
    %28 = arith.mulf %26, %27 : vector<2x4x128xf32>
    %29 = arith.addf %9, %28 : vector<2x4x128xf32>
    %30 = vector.broadcast %11 : vector<2x1x128xf32> to vector<2x4x128xf32>
    %31 = vector.broadcast %14 : vector<1x4x128xf32> to vector<2x4x128xf32>
    %32 = arith.mulf %30, %31 : vector<2x4x128xf32>
    %33 = arith.addf %29, %32 : vector<2x4x128xf32>
    %34 = vector.extract_strided_slice %1 {offsets = [0, 1, 0], sizes = [2, 1, 128], strides = [1, 1, 1]} : vector<2x4x128xf32> to vector<2x1x128xf32>
    %35 = vector.extract_strided_slice %3 {offsets = [0, 1, 0], sizes = [2, 1, 128], strides = [1, 1, 1]} : vector<2x4x128xf32> to vector<2x1x128xf32>
    %36 = vector.extract_strided_slice %5 {offsets = [1, 0, 0], sizes = [1, 4, 128], strides = [1, 1, 1]} : vector<4x4x128xf32> to vector<1x4x128xf32>
    %37 = vector.shape_cast %36 : vector<1x4x128xf32> to vector<4x128xf32>
    %38 = vector.shape_cast %37 : vector<4x128xf32> to vector<1x4x128xf32>
    %39 = vector.extract_strided_slice %7 {offsets = [1, 0, 0], sizes = [1, 4, 128], strides = [1, 1, 1]} : vector<4x4x128xf32> to vector<1x4x128xf32>
    %40 = vector.shape_cast %39 : vector<1x4x128xf32> to vector<4x128xf32>
    %41 = vector.shape_cast %40 : vector<4x128xf32> to vector<1x4x128xf32>
    %42 = vector.broadcast %34 : vector<2x1x128xf32> to vector<2x4x128xf32>
    %43 = vector.broadcast %38 : vector<1x4x128xf32> to vector<2x4x128xf32>
    %44 = arith.mulf %42, %43 : vector<2x4x128xf32>
    %45 = arith.addf %25, %44 : vector<2x4x128xf32>
    %46 = vector.broadcast %35 : vector<2x1x128xf32> to vector<2x4x128xf32>
    %47 = vector.broadcast %41 : vector<1x4x128xf32> to vector<2x4x128xf32>
    %48 = arith.mulf %46, %47 : vector<2x4x128xf32>
    %49 = arith.subf %45, %48 : vector<2x4x128xf32>
    %50 = vector.broadcast %34 : vector<2x1x128xf32> to vector<2x4x128xf32>
    %51 = vector.broadcast %41 : vector<1x4x128xf32> to vector<2x4x128xf32>
    %52 = arith.mulf %50, %51 : vector<2x4x128xf32>
    %53 = arith.addf %33, %52 : vector<2x4x128xf32>
    %54 = vector.broadcast %35 : vector<2x1x128xf32> to vector<2x4x128xf32>
    %55 = vector.broadcast %38 : vector<1x4x128xf32> to vector<2x4x128xf32>
    %56 = arith.mulf %54, %55 : vector<2x4x128xf32>
    %57 = arith.addf %53, %56 : vector<2x4x128xf32>
    %58 = vector.extract_strided_slice %1 {offsets = [0, 2, 0], sizes = [2, 1, 128], strides = [1, 1, 1]} : vector<2x4x128xf32> to vector<2x1x128xf32>
    %59 = vector.extract_strided_slice %3 {offsets = [0, 2, 0], sizes = [2, 1, 128], strides = [1, 1, 1]} : vector<2x4x128xf32> to vector<2x1x128xf32>
    %60 = vector.extract_strided_slice %5 {offsets = [2, 0, 0], sizes = [1, 4, 128], strides = [1, 1, 1]} : vector<4x4x128xf32> to vector<1x4x128xf32>
    %61 = vector.shape_cast %60 : vector<1x4x128xf32> to vector<4x128xf32>
    %62 = vector.shape_cast %61 : vector<4x128xf32> to vector<1x4x128xf32>
    %63 = vector.extract_strided_slice %7 {offsets = [2, 0, 0], sizes = [1, 4, 128], strides = [1, 1, 1]} : vector<4x4x128xf32> to vector<1x4x128xf32>
    %64 = vector.shape_cast %63 : vector<1x4x128xf32> to vector<4x128xf32>
    %65 = vector.shape_cast %64 : vector<4x128xf32> to vector<1x4x128xf32>
    %66 = vector.broadcast %58 : vector<2x1x128xf32> to vector<2x4x128xf32>
    %67 = vector.broadcast %62 : vector<1x4x128xf32> to vector<2x4x128xf32>
    %68 = arith.mulf %66, %67 : vector<2x4x128xf32>
    %69 = arith.addf %49, %68 : vector<2x4x128xf32>
    %70 = vector.broadcast %59 : vector<2x1x128xf32> to vector<2x4x128xf32>
    %71 = vector.broadcast %65 : vector<1x4x128xf32> to vector<2x4x128xf32>
    %72 = arith.mulf %70, %71 : vector<2x4x128xf32>
    %73 = arith.subf %69, %72 : vector<2x4x128xf32>
    %74 = vector.broadcast %58 : vector<2x1x128xf32> to vector<2x4x128xf32>
    %75 = vector.broadcast %65 : vector<1x4x128xf32> to vector<2x4x128xf32>
    %76 = arith.mulf %74, %75 : vector<2x4x128xf32>
    %77 = arith.addf %57, %76 : vector<2x4x128xf32>
    %78 = vector.broadcast %59 : vector<2x1x128xf32> to vector<2x4x128xf32>
    %79 = vector.broadcast %62 : vector<1x4x128xf32> to vector<2x4x128xf32>
    %80 = arith.mulf %78, %79 : vector<2x4x128xf32>
    %81 = arith.addf %77, %80 : vector<2x4x128xf32>
    %82 = vector.extract_strided_slice %1 {offsets = [0, 3, 0], sizes = [2, 1, 128], strides = [1, 1, 1]} : vector<2x4x128xf32> to vector<2x1x128xf32>
    %83 = vector.extract_strided_slice %3 {offsets = [0, 3, 0], sizes = [2, 1, 128], strides = [1, 1, 1]} : vector<2x4x128xf32> to vector<2x1x128xf32>
    %84 = vector.extract_strided_slice %5 {offsets = [3, 0, 0], sizes = [1, 4, 128], strides = [1, 1, 1]} : vector<4x4x128xf32> to vector<1x4x128xf32>
    %85 = vector.shape_cast %84 : vector<1x4x128xf32> to vector<4x128xf32>
    %86 = vector.shape_cast %85 : vector<4x128xf32> to vector<1x4x128xf32>
    %87 = vector.extract_strided_slice %7 {offsets = [3, 0, 0], sizes = [1, 4, 128], strides = [1, 1, 1]} : vector<4x4x128xf32> to vector<1x4x128xf32>
    %88 = vector.shape_cast %87 : vector<1x4x128xf32> to vector<4x128xf32>
    %89 = vector.shape_cast %88 : vector<4x128xf32> to vector<1x4x128xf32>
    %90 = vector.broadcast %82 : vector<2x1x128xf32> to vector<2x4x128xf32>
    %91 = vector.broadcast %86 : vector<1x4x128xf32> to vector<2x4x128xf32>
    %92 = arith.mulf %90, %91 : vector<2x4x128xf32>
    %93 = arith.addf %73, %92 : vector<2x4x128xf32>
    %94 = vector.broadcast %83 : vector<2x1x128xf32> to vector<2x4x128xf32>
    %95 = vector.broadcast %89 : vector<1x4x128xf32> to vector<2x4x128xf32>
    %96 = arith.mulf %94, %95 : vector<2x4x128xf32>
    %97 = arith.subf %93, %96 : vector<2x4x128xf32>
    %98 = vector.broadcast %82 : vector<2x1x128xf32> to vector<2x4x128xf32>
    %99 = vector.broadcast %89 : vector<1x4x128xf32> to vector<2x4x128xf32>
    %100 = arith.mulf %98, %99 : vector<2x4x128xf32>
    %101 = arith.addf %81, %100 : vector<2x4x128xf32>
    %102 = vector.broadcast %83 : vector<2x1x128xf32> to vector<2x4x128xf32>
    %103 = vector.broadcast %86 : vector<1x4x128xf32> to vector<2x4x128xf32>
    %104 = arith.mulf %102, %103 : vector<2x4x128xf32>
    %105 = arith.addf %101, %104 : vector<2x4x128xf32>
    %c0_15 = arith.constant 0 : index
    %c0_16 = arith.constant 0 : index
    %c0_17 = arith.constant 0 : index
    %c0_18 = arith.constant 0 : index
    %106 = vector.load %arg3[%c0_15, %c0_16, %c0_17, %c0_18] : memref<2x2x6x128xf32, #tpu.memory_space<vmem>>, vector<1x2x4x128xf32>
    %107 = vector.shape_cast %106 : vector<1x2x4x128xf32> to vector<2x4x128xf32>
    %108 = vector.shape_cast %97 : vector<2x4x128xf32> to vector<1x2x4x128xf32>
    tpu.vector_store %arg3[%c0_15, %c0_16, %c0_17, %c0_18], %108 {strides = array<i32>} : memref<2x2x6x128xf32, #tpu.memory_space<vmem>>, vector<1x2x4x128xf32>,
    %c1_19 = arith.constant 1 : index
    %c0_20 = arith.constant 0 : index
    %c0_21 = arith.constant 0 : index
    %c0_22 = arith.constant 0 : index
    %109 = vector.load %arg3[%c1_19, %c0_20, %c0_21, %c0_22] : memref<2x2x6x128xf32, #tpu.memory_space<vmem>>, vector<1x2x4x128xf32>
    %110 = vector.shape_cast %109 : vector<1x2x4x128xf32> to vector<2x4x128xf32>
    %111 = vector.shape_cast %105 : vector<2x4x128xf32> to vector<1x2x4x128xf32>
    tpu.vector_store %arg3[%c1_19, %c0_20, %c0_21, %c0_22], %111 {strides = array<i32>} : memref<2x2x6x128xf32, #tpu.memory_space<vmem>>, vector<1x2x4x128xf32>,
    %112 = vector.extract_strided_slice %97 {offsets = [0, 0, 0], sizes = [2, 1, 128], strides = [1, 1, 1]} : vector<2x4x128xf32> to vector<2x1x128xf32>
    %113 = vector.shape_cast %112 : vector<2x1x128xf32> to vector<2x128xf32>
    %114 = vector.extract_strided_slice %105 {offsets = [0, 0, 0], sizes = [2, 1, 128], strides = [1, 1, 1]} : vector<2x4x128xf32> to vector<2x1x128xf32>
    %115 = vector.shape_cast %114 : vector<2x1x128xf32> to vector<2x128xf32>
    %116 = vector.extract_strided_slice %97 {offsets = [0, 1, 0], sizes = [2, 1, 128], strides = [1, 1, 1]} : vector<2x4x128xf32> to vector<2x1x128xf32>
    %117 = vector.shape_cast %116 : vector<2x1x128xf32> to vector<2x128xf32>
    %118 = vector.extract_strided_slice %105 {offsets = [0, 1, 0], sizes = [2, 1, 128], strides = [1, 1, 1]} : vector<2x4x128xf32> to vector<2x1x128xf32>
    %119 = vector.shape_cast %118 : vector<2x1x128xf32> to vector<2x128xf32>
    %120 = arith.mulf %113, %117 : vector<2x128xf32>
    %121 = arith.mulf %115, %119 : vector<2x128xf32>
    %122 = arith.subf %120, %121 : vector<2x128xf32>
    %123 = arith.mulf %113, %119 : vector<2x128xf32>
    %124 = arith.mulf %115, %117 : vector<2x128xf32>
    %125 = arith.addf %123, %124 : vector<2x128xf32>
    %126 = vector.extract_strided_slice %97 {offsets = [0, 2, 0], sizes = [2, 1, 128], strides = [1, 1, 1]} : vector<2x4x128xf32> to vector<2x1x128xf32>
    %127 = vector.shape_cast %126 : vector<2x1x128xf32> to vector<2x128xf32>
    %128 = vector.extract_strided_slice %105 {offsets = [0, 2, 0], sizes = [2, 1, 128], strides = [1, 1, 1]} : vector<2x4x128xf32> to vector<2x1x128xf32>
    %129 = vector.shape_cast %128 : vector<2x1x128xf32> to vector<2x128xf32>
    %130 = vector.extract_strided_slice %97 {offsets = [0, 3, 0], sizes = [2, 1, 128], strides = [1, 1, 1]} : vector<2x4x128xf32> to vector<2x1x128xf32>
    %131 = vector.shape_cast %130 : vector<2x1x128xf32> to vector<2x128xf32>
    %132 = vector.extract_strided_slice %105 {offsets = [0, 3, 0], sizes = [2, 1, 128], strides = [1, 1, 1]} : vector<2x4x128xf32> to vector<2x1x128xf32>
    %133 = vector.shape_cast %132 : vector<2x1x128xf32> to vector<2x128xf32>
    %134 = arith.mulf %127, %131 : vector<2x128xf32>
    %135 = arith.mulf %129, %133 : vector<2x128xf32>
    %136 = arith.subf %134, %135 : vector<2x128xf32>
    %137 = arith.mulf %127, %133 : vector<2x128xf32>
    %138 = arith.mulf %129, %131 : vector<2x128xf32>
    %139 = arith.addf %137, %138 : vector<2x128xf32>
    %140 = vector.shape_cast %122 : vector<2x128xf32> to vector<2x1x128xf32>
    %141 = vector.shape_cast %136 : vector<2x128xf32> to vector<2x1x128xf32>
    %142 = tpu.concatenate %140, %141 in 1 : vector<2x1x128xf32>, vector<2x1x128xf32> -> vector<2x2x128xf32>
    %c0_23 = arith.constant 0 : index
    %c0_24 = arith.constant 0 : index
    %c4 = arith.constant 4 : index
    %c0_25 = arith.constant 0 : index
    %143 = vector.load %arg3[%c0_23, %c0_24, %c4, %c0_25] : memref<2x2x6x128xf32, #tpu.memory_space<vmem>>, vector<1x2x2x128xf32>
    %144 = vector.shape_cast %143 : vector<1x2x2x128xf32> to vector<2x2x128xf32>
    %145 = vector.shape_cast %142 : vector<2x2x128xf32> to vector<1x2x2x128xf32>
    tpu.vector_store %arg3[%c0_23, %c0_24, %c4, %c0_25], %145 {strides = array<i32>} : memref<2x2x6x128xf32, #tpu.memory_space<vmem>>, vector<1x2x2x128xf32>,
    %146 = vector.shape_cast %125 : vector<2x128xf32> to vector<2x1x128xf32>
    %147 = vector.shape_cast %139 : vector<2x128xf32> to vector<2x1x128xf32>
    %148 = tpu.concatenate %146, %147 in 1 : vector<2x1x128xf32>, vector<2x1x128xf32> -> vector<2x2x128xf32>
    %c1_26 = arith.constant 1 : index
    %c0_27 = arith.constant 0 : index
    %c4_28 = arith.constant 4 : index
    %c0_29 = arith.constant 0 : index
    %149 = vector.load %arg3[%c1_26, %c0_27, %c4_28, %c0_29] : memref<2x2x6x128xf32, #tpu.memory_space<vmem>>, vector<1x2x2x128xf32>
    %150 = vector.shape_cast %149 : vector<1x2x2x128xf32> to vector<2x2x128xf32>
    %151 = vector.shape_cast %148 : vector<2x2x128xf32> to vector<1x2x2x128xf32>
    tpu.vector_store %arg3[%c1_26, %c0_27, %c4_28, %c0_29], %151 {strides = array<i32>} : memref<2x2x6x128xf32, #tpu.memory_space<vmem>>, vector<1x2x2x128xf32>,
    return
  }
  func.func @transform_0(%arg0: i32) -> (i32, i32, i32, i32) {
    %c0_i32 = arith.constant 0 : i32
    %c0_i32_0 = arith.constant 0 : i32
    %c0_i32_1 = arith.constant 0 : i32
    %c0_i32_2 = arith.constant 0 : i32
    return %c0_i32, %c0_i32_0, %c0_i32_1, %arg0 : i32, i32, i32, i32
  }
  func.func @transform_1(%arg0: i32) -> (i32, i32, i32, i32) {
    %c0_i32 = arith.constant 0 : i32
    %c0_i32_0 = arith.constant 0 : i32
    %c0_i32_1 = arith.constant 0 : i32
    %c0_i32_2 = arith.constant 0 : i32
    return %c0_i32, %c0_i32_0, %c0_i32_1, %arg0 : i32, i32, i32, i32
  }
  func.func @transform_2(%arg0: i32) -> (i32, i32, i32, i32) {
    %c0_i32 = arith.constant 0 : i32
    %c0_i32_0 = arith.constant 0 : i32
    %c0_i32_1 = arith.constant 0 : i32
    %c0_i32_2 = arith.constant 0 : i32
    return %c0_i32, %c0_i32_0, %c0_i32_1, %arg0 : i32, i32, i32, i32
  }
}

</mosaic_0001>

<bundles_post_ra>
// kernel: custom-call.1
= control target key start
LH: loop header
LB: loop body
LE: loop exit
PB: predicated region body
PF: predicated region fallthrough
CT: control target
= control target key end

     0   :  { %s59_s0 = inlined_call_operand.hbm [shape: c64[4,4,8,8], index: 0, kind: input, shape index: {}]   ;;  %s60_s1 = inlined_call_operand.vmem [shape: f32[4,4,8,8], index: 1, kind: output, shape index: {}]  }
   0x1   :  { %s2_s8 = scalar_lea.hbm %s59_s0, 2048 }
   0x2   :  { %3 = vsyncpa [#allocation0], 0  ;;  %s4_s11 = sshll.u32 %s60_s1, 4  ;;  %s34_s14 = scalar_lea.hbm %s59_s0, 4096  ;;  %s5_s11 = int_to_ptr.vmem [resolvable:$true] %s4_s11 }
   0x3   :  { %p11_p0 = scmp.ne.s32.totalorder %s2_s8, %s34_s14  ;;  %p13_p1 = scmp.lt.u32.totalorder %s2_s8, %s59_s0 }
   0x4   :  { %p14_p2 = scmp.lt.u32.totalorder %s34_s14, %s34_s14  ;;  %p16_p4 = scmp.lt.u32.totalorder %s34_s14, %s2_s8 }
   0x6   :  { %p15_p3 = por %p14_p2, %p13_p1 }
   0x8   :  { %p17_p5 = por %p16_p4, %p15_p3 }
   0xa   :  { %p18_p6 = pnand %p17_p5, %p11_p0 }
   0xc   :  { %21 = shalt.err (!%p18_p6)  }
   0xd   :  { %s22_s17 = scalar_lea.vmem %s5_s11, 2048  ;;  %p27_p8 = scmp.lt.s32.totalorder %s5_s11, %s5_s11 }
   0xe   :  { %p23_p7 = scmp.ne.s32.totalorder %s5_s11, %s22_s17  ;;  %p28_p9 = scmp.lt.s32.totalorder %s22_s17, %s22_s17 }
  0x10   :  { %p29_p10 = por %p28_p9, %p27_p8 }
  0x12   :  { %p30_p11 = pnand %p29_p10, %p23_p7 }
  0x14   :  { %33 = shalt.err (!%p30_p11)  }
  0x15   :  { %7 = dma.hbm_to_vmem [thread:$0]  %s2_s8, 2048, %s5_s11, [#allocation0] }
  0x16   :  { %35 = dma.done.wait [#allocation0], 2048  }
  0x17   :  { %36 = vsyncadd [#allocation0], 4294965248 }
  0x18   :  { %9 = vsyncpa [#allocation0], 1 }

// kernel: custom-call
= control target key start
LH: loop header
LB: loop body
LE: loop exit
PB: predicated region body
PF: predicated region fallthrough
CT: control target
= control target key end

     0   :  { %2 = vsyncpa [#allocation0], 0  ;;  %s61_s0 = inlined_call_operand.hbm [shape: c64[4,4,8,8], index: 0, kind: input, shape index: {}]   ;;  %s62_s1 = inlined_call_operand.vmem [shape: f32[4,4,8,8], index: 1, kind: output, shape index: {}]  }
   0x1   :  { %s3_s8 = sshll.u32 %s62_s1, 4  ;;  %s9_s11 = scalar_lea.hbm %s61_s0, 2048  ;;  %s4_s8 = int_to_ptr.vmem [resolvable:$true] %s3_s8 }
   0x2   :  { %p10_p0 = scmp.ne.s32.totalorder %s61_s0, %s9_s11  ;;  %s11_s16 = scalar_lea.hbm %s61_s0, 4096 }
   0x3   :  { %p12_p1 = scmp.lt.u32.totalorder %s11_s16, %s9_s11  ;;  %p13_p2 = scmp.lt.u32.totalorder %s9_s11, %s61_s0 }
   0x5   :  { %p14_p3 = por %p13_p2, %p12_p1 }
   0x7   :  { %p15_p4 = pnand %p14_p3, %p10_p0 }
   0x9   :  { %18 = shalt.err (!%p15_p4)  }
   0xa   :  { %s19_s1 = scalar_lea.vmem %s4_s8, 2048  ;;  %p24_p6 = scmp.lt.s32.totalorder %s4_s8, %s4_s8 }
   0xb   :  { %p20_p5 = scmp.ne.s32.totalorder %s4_s8, %s19_s1  ;;  %p25_p7 = scmp.lt.s32.totalorder %s19_s1, %s19_s1 }
   0xd   :  { %p26_p8 = por %p25_p7, %p24_p6 }
   0xf   :  { %p27_p9 = pnand %p26_p8, %p20_p5 }
  0x11   :  { %30 = shalt.err (!%p27_p9)  }
  0x12   :  { %6 = dma.hbm_to_vmem [thread:$0]  %s61_s0, 2048, %s4_s8, [#allocation0] }
  0x13   :  { %31 = dma.done.wait [#allocation0], 2048  }
  0x14   :  { %32 = vsyncadd [#allocation0], 4294965248 }
  0x15   :  { %8 = vsyncpa [#allocation0], 1 }

// kernel: spectral_conv_prod2d.1
= control target key start
LH: loop header
LB: loop body
LE: loop exit
PB: predicated region body
PF: predicated region fallthrough
CT: control target
= control target key end

     0   :  { %v25_v0 = vlaneseq  ;;  %vm188_vm0 = vcmask 1040384   ;;  %s304_s0 = inlined_call_operand.vmem [shape: f32[2,2,4,128], index: 0, kind: input, shape index: {}]   ;;  %s305_s1 = inlined_call_operand.vmem [shape: f32[2,4,4,128], index: 1, kind: input, shape index: {}]   ;;  %s306_s2 = inlined_call_operand.vmem [shape: f32[2,2,6,128], index: 2, kind: output, shape index: {}]  }
   0x1   :  { %v11_v2 = vld [vmem:[%s304_s0] sm:$0xf]  ;;  %v207_v3 = vld [vmem:[%s304_s0 + $0x8] sm:$0xf]  ;;  %v17_v8 = vld [vmem:[%s305_s1 + $0x4] sm:$0xf] }
   0x2   :  { %v26_v1 = vshrl.u32 %v25_v0, 7  ;;  %v16_v4 = vld [vmem:[%s305_s1] sm:$0xf]  ;;  %v209_v9 = vld [vmem:[%s305_s1 + $0x10] sm:$0xf] }
   0x3   :  { %v12_v16 = vld [vmem:[%s304_s0 + $0x4] sm:$0xf]  ;;  %v208_v17 = vld [vmem:[%s304_s0 + $0xc] sm:$0xf]  ;;  %v256_v18 = vld [vmem:[%s305_s1 + $0x8] sm:$0xf] }
   0x4   :  { %v27_v5 = vsub.s32 0, %v26_v1  ;;  %v59_v6 = vsub.s32 1, %v26_v1  ;;  %v91_v7 = vsub.s32 2, %v26_v1  ;;  %v123_v10 = vsub.s32 3, %v26_v1  ;;  %v210_v19 = vld [vmem:[%s305_s1 + $0x14] sm:$0xf] }
   0x5   :  { %v264_v27 = vld [vmem:[%s305_s1 + $0xc] sm:$0xf]  ;;  %v211_v36 = vld [vmem:[%s305_s1 + $0x18] sm:$0xf]  ;;  %v212_v43 = vld [vmem:[%s305_s1 + $0x1c] sm:$0xf] }
   0x6   :  { %v28_v11 = vrot.slane %v11_v2, %v27_v5  ;;  %v40_v12 = vrot.slane %v207_v3, %v27_v5  ;;  %v60_v13 = vrot.slane %v11_v2, %v59_v6  ;;  %v72_v14 = vrot.slane %v207_v3, %v59_v6 }
   0x7   :  { %v92_v15 = vrot.slane %v11_v2, %v91_v7  ;;  %v104_v24 = vrot.slane %v207_v3, %v91_v7  ;;  %v124_v25 = vrot.slane %v11_v2, %v123_v10  ;;  %v136_v26 = vrot.slane %v207_v3, %v123_v10 }
   0x8   :  { %v33_v20 = vmul.f32 %v28_v11, %v16_v4  ;;  %v45_v21 = vmul.f32 %v209_v9, %v40_v12  ;;  %v65_v22 = vmul.f32 %v60_v13, %v17_v8  ;;  %v77_v23 = vmul.f32 %v210_v19, %v72_v14 }
   0x9   :  { %v32_v29 = vrot.slane %v12_v16, %v27_v5  ;;  %v44_v30 = vrot.slane %v208_v17, %v27_v5  ;;  %v64_v31 = vrot.slane %v12_v16, %v59_v6  ;;  %v97_v32 = vmul.f32 %v92_v15, %v256_v18 }
   0xa   :  { %v47_v28 = vsub.f32 %v33_v20, %v45_v21  ;;  %v76_v33 = vrot.slane %v208_v17, %v59_v6  ;;  %v96_v34 = vrot.slane %v12_v16, %v91_v7  ;;  %v108_v35 = vrot.slane %v208_v17, %v91_v7 }
   0xb   :  { %v34_v38 = vmul.f32 %v32_v29, %v16_v4  ;;  %v46_v39 = vmul.f32 %v209_v9, %v44_v30  ;;  %v66_v40 = vmul.f32 %v64_v31, %v17_v8  ;;  %v109_v41 = vmul.f32 %v211_v36, %v104_v24 }
   0xc   :  { %v67_v37 = vadd.f32 %v65_v22, %v47_v28  ;;  %v129_v42 = vmul.f32 %v124_v25, %v264_v27  ;;  %v78_v46 = vmul.f32 %v210_v19, %v76_v33  ;;  %v49_v47 = vmul.f32 %v209_v9, %v28_v11 }
   0xd   :  { %v48_v45 = vsub.f32 %v34_v38, %v46_v39  ;;  %v141_v48 = vmul.f32 %v212_v43, %v136_v26  ;;  %v128_v49 = vrot.slane %v12_v16, %v123_v10  ;;  %v53_v50 = vmul.f32 %v40_v12, %v16_v4 }
   0xe   :  { %v79_v44 = vsub.f32 %v67_v37, %v77_v23  ;;  %v81_v51 = vmul.f32 %v210_v19, %v60_v13  ;;  %v98_v54 = vmul.f32 %v96_v34, %v256_v18  ;;  %v110_v55 = vmul.f32 %v211_v36, %v108_v35 }
   0xf   :  { %v68_v53 = vadd.f32 %v66_v40, %v48_v45  ;;  %v140_v56 = vrot.slane %v208_v17, %v123_v10  ;;  %v55_v57 = vadd.f32 %v53_v50, %v49_v47  ;;  %v85_v58 = vmul.f32 %v72_v14, %v17_v8 }
  0x10   :  { %v99_v52 = vadd.f32 %v97_v32, %v79_v44  ;;  %v50_v59 = vmul.f32 %v209_v9, %v32_v29  ;;  %v54_v62 = vmul.f32 %v44_v30, %v16_v4  ;;  %v82_v63 = vmul.f32 %v210_v19, %v64_v31 }
  0x11   :  { %v80_v61 = vsub.f32 %v68_v53, %v78_v46  ;;  %v130_v0 = vmul.f32 %v128_v49, %v264_v27  ;;  %v83_v1 = vadd.f32 %v81_v51, %v55_v57  ;;  %v113_v2 = vmul.f32 %v211_v36, %v92_v15 }
  0x12   :  { %v111_v60 = vsub.f32 %v99_v52, %v109_v41  ;;  %v56_v6 = vadd.f32 %v54_v62, %v50_v59  ;;  %v86_v7 = vmul.f32 %v76_v33, %v17_v8  ;;  %v142_v11 = vmul.f32 %v212_v43, %v140_v56 }
  0x13   :  { %v100_v5 = vadd.f32 %v98_v54, %v80_v61  ;;  %v87_v12 = vadd.f32 %v85_v58, %v83_v1  ;;  %v117_v13 = vmul.f32 %v104_v24, %v256_v18  ;;  %v114_v9 = vmul.f32 %v211_v36, %v96_v34 }
  0x14   :  { %v131_v3 = vadd.f32 %v129_v42, %v111_v60  ;;  %v84_v14 = vadd.f32 %v82_v63, %v56_v6  ;;  %v145_v20 = vmul.f32 %v212_v43, %v124_v25  ;;  %v118_v19 = vmul.f32 %v108_v35, %v256_v18 }
  0x15   :  { %v112_v16 = vsub.f32 %v100_v5, %v110_v55  ;;  %v115_v17 = vadd.f32 %v113_v2, %v87_v12  ;;  %v149_v8 = vmul.f32 %v136_v26, %v264_v27  ;;  %v146_v24 = vmul.f32 %v212_v43, %v128_v49 }
  0x16   :  { %v143_v10 = vsub.f32 %v131_v3, %v141_v48  ;;  %v88_v15 = vadd.f32 %v86_v7, %v84_v14  ;;  %v150_v30 = vmul.f32 %v140_v56, %v264_v27 }
  0x17   :  { %v132_v4 = vadd.f32 %v130_v0, %v112_v16  ;;  %v119_v21 = vadd.f32 %v117_v13, %v115_v17 }
  0x18   :  { %153 = vst [vmem:[%s306_s2] sm:$0xf] %v143_v10  ;;  %v116_v23 = vadd.f32 %v114_v9, %v88_v15  ;;  %v160_v29 = vrot.slane %v143_v10, 1 }
  0x19   :  { %v144_v22 = vsub.f32 %v132_v4, %v142_v11  ;;  %v147_v28 = vadd.f32 %v145_v20, %v119_v21 }
  0x1a   :  { %v120_v25 = vadd.f32 %v118_v19, %v116_v23  ;;  %v164_v18 = vmul.f32 %v160_v29, %v143_v10 }
  0x1b   :  { %154 = vst [vmem:[%s306_s2 + $0x8] sm:$0xf] %v144_v22  ;;  %v151_v31 = vadd.f32 %v149_v8, %v147_v28  ;;  %v161_v33 = vrot.slane %v144_v22, 1 }
  0x1c   :  { %v148_v32 = vadd.f32 %v146_v24, %v120_v25 }
  0x1d   :  { %213 = vst [vmem:[%s306_s2 + $0x10] sm:$0xf] %v151_v31  ;;  %v168_v26 = vrot.slane %v151_v31, 1  ;;  %v178_v34 = vmul.f32 %v160_v29, %v151_v31  ;;  %v165_v38 = vmul.f32 %v161_v33, %v144_v22 }
  0x1e   :  { %v152_v35 = vadd.f32 %v150_v30, %v148_v32 }
  0x1f   :  { %v172_v36 = vmul.f32 %v168_v26, %v151_v31  ;;  %v176_v37 = vmul.f32 %v168_v26, %v143_v10 }
  0x20   :  { %214 = vst [vmem:[%s306_s2 + $0x18] sm:$0xf] %v152_v35  ;;  %v169_v39 = vrot.slane %v152_v35, 1  ;;  %v179_v27 = vmul.f32 %v161_v33, %v152_v35 }
  0x21   :  { %v174_v40 = vsub.f32 %v164_v18, %v172_v36  ;;  %v180_v41 = vadd.f32 %v178_v34, %v176_v37 }
  0x22   :  { %v173_v42 = vmul.f32 %v169_v39, %v152_v35  ;;  %v177_v43 = vmul.f32 %v169_v39, %v144_v22 }
  0x23   :  { %v184_v44 = vrot.slane %v174_v40, 1  ;;  %v195_v45 = vrot.slane %v180_v41, 1 }
  0x24   :  { %v175_v46 = vsub.f32 %v165_v38, %v173_v42  ;;  %v181_v47 = vadd.f32 %v179_v27, %v177_v43 }
  0x25   :  { %v189_v48 = vsel %vm188_vm0, %v174_v40, %v184_v44  ;;  %v199_v49 = vsel %vm188_vm0, %v180_v41, %v195_v45 }
  0x26   :  { %191 = vst [vmem:[%s306_s2 + $0x4] sm:$0x3] %v189_v48  ;;  %v185_v50 = vrot.slane %v175_v46, 1  ;;  %215 = vst [vmem:[%s306_s2 + $0x14] sm:$0x3] %v199_v49  ;;  %v196_v51 = vrot.slane %v181_v47, 1 }
  0x28   :  { %v190_v52 = vsel %vm188_vm0, %v175_v46, %v185_v50  ;;  %v200_v53 = vsel %vm188_vm0, %v181_v47, %v196_v51 }
  0x29   :  { %192 = vst [vmem:[%s306_s2 + $0xc] sm:$0x3] %v190_v52  ;;  %216 = vst [vmem:[%s306_s2 + $0x1c] sm:$0x3] %v200_v53 }

// kernel: reverse.1
= control target key start
LH: loop header
LB: loop body
LE: loop exit
PB: predicated region body
PF: predicated region fallthrough
CT: control target
= control target key end

     0   :  { %v87_v3 = vlaneseq  ;;  %v80_v14 = vld [vmem:[#allocation0 + $0x7] ss:$-1 sm:$0xff]  ;;  %v94_v15 = vld [vmem:[#allocation0 + $0x17] ss:$-1 sm:$0xff]  ;;  %s472_s0 = inlined_call_operand.vmem [shape: f32[2,6,16,7], index: 0, kind: input, shape index: {}]   ;;  %s473_s1 = inlined_call_operand.vmem [shape: f32[2,6,16,7], index: 1, kind: output, shape index: {}]  }
   0x1   :  { %v52_v0 = vld [vmem:[%s472_s0] sm:$0xff]  ;;  %v54_v1 = vld [vmem:[%s472_s0 + $0x8] sm:$0xff]  ;;  %v56_v2 = vld [vmem:[%s472_s0 + $0x10] sm:$0xff]  ;;  %v81_v16 = vrot.slane %v80_v14, 1  ;;  %v95_v17 = vrot.slane %v94_v15, 1 }
   0x2   :  { %53 = vst [vmem:[#allocation0 + $0x8] sm:$0xff] %v52_v0  ;;  %55 = vst [vmem:[#allocation0 + $0x18] sm:$0xff] %v54_v1  ;;  %v58_v4 = vld [vmem:[%s472_s0 + $0x18] sm:$0xff]  ;;  %v60_v5 = vld [vmem:[%s472_s0 + $0x20] sm:$0xff]  ;;  %v400_v10 = vshrl.u32 %v87_v3, 7 }
   0x3   :  { %57 = vst [vmem:[#allocation0 + $0x28] sm:$0xff] %v56_v2  ;;  %v62_v6 = vld [vmem:[%s472_s0 + $0x28] sm:$0xff]  ;;  %59 = vst [vmem:[#allocation0 + $0x38] sm:$0xff] %v58_v4  ;;  %v64_v7 = vld [vmem:[%s472_s0 + $0x30] sm:$0xff] }
   0x4   :  { %61 = vst [vmem:[#allocation0 + $0x48] sm:$0xff] %v60_v5  ;;  %63 = vst [vmem:[#allocation0 + $0x58] sm:$0xff] %v62_v6  ;;  %v66_v8 = vld [vmem:[%s472_s0 + $0x38] sm:$0xff]  ;;  %v68_v9 = vld [vmem:[%s472_s0 + $0x40] sm:$0xff]  ;;  %vm89_vm0 = vcmp.lt.s32.totalorder %v400_v10, 7 }
   0x5   :  { %65 = vst [vmem:[#allocation0 + $0x68] sm:$0xff] %v64_v7  ;;  %67 = vst [vmem:[#allocation0 + $0x78] sm:$0xff] %v66_v8  ;;  %v70_v11 = vld [vmem:[%s472_s0 + $0x48] sm:$0xff]  ;;  %v72_v12 = vld [vmem:[%s472_s0 + $0x50] sm:$0xff] }
   0x6   :  { %69 = vst [vmem:[#allocation0 + $0x88] sm:$0xff] %v68_v9  ;;  %v74_v13 = vld [vmem:[%s472_s0 + $0x58] sm:$0xff]  ;;  %71 = vst [vmem:[#allocation0 + $0x98] sm:$0xff] %v70_v11  ;;  %v108_v18 = vld [vmem:[#allocation0 + $0x27] ss:$-1 sm:$0xff] }
   0x7   :  { %73 = vst [vmem:[#allocation0 + $0xa8] sm:$0xff] %v72_v12  ;;  %75 = vst [vmem:[#allocation0 + $0xb8] sm:$0xff] %v74_v13  ;;  %v122_v19 = vld [vmem:[#allocation0 + $0x37] ss:$-1 sm:$0xff]  ;;  %v109_v20 = vrot.slane %v108_v18, 1 }
   0x8   :  { %v123_v21 = vrot.slane %v122_v19, 1  ;;  %v136_v22 = vld [vmem:[#allocation0 + $0x47] ss:$-1 sm:$0xff]  ;;  %v150_v23 = vld [vmem:[#allocation0 + $0x57] ss:$-1 sm:$0xff]  ;;  %82 = vst [vmem:[#allocation1] sm:$0xff] %v81_v16 }
   0x9   :  { %96 = vst [vmem:[#allocation1 + $0x8] sm:$0xff] %v95_v17  ;;  %v137_v24 = vrot.slane %v136_v22, 1  ;;  %v151_v25 = vrot.slane %v150_v23, 1  ;;  %v164_v26 = vld [vmem:[#allocation0 + $0x67] ss:$-1 sm:$0xff]  ;;  %110 = vst [vmem:[#allocation1 + $0x10] sm:$0xff] %v109_v20 }
   0xa   :  { %v178_v27 = vld [vmem:[#allocation0 + $0x77] ss:$-1 sm:$0xff]  ;;  %v85_v28 = vld [vmem:[#allocation0 + $0xf] ss:$-1 sm:$0xff]  ;;  %v99_v29 = vld [vmem:[#allocation0 + $0x1f] ss:$-1 sm:$0xff] }
   0xb   :  { %v113_v30 = vld [vmem:[#allocation0 + $0x2f] ss:$-1 sm:$0xff]  ;;  %124 = vst [vmem:[#allocation1 + $0x18] sm:$0xff] %v123_v21  ;;  %v86_v31 = vrot.slane %v85_v28, 1  ;;  %v100_v32 = vrot.slane %v99_v29, 1  ;;  %138 = vst [vmem:[#allocation1 + $0x20] sm:$0xff] %v137_v24 }
   0xc   :  { %v114_v33 = vrot.slane %v113_v30, 1  ;;  %v127_v34 = vld [vmem:[#allocation0 + $0x3f] ss:$-1 sm:$0xff]  ;;  %152 = vst [vmem:[#allocation1 + $0x28] sm:$0xff] %v151_v25  ;;  %v165_v35 = vrot.slane %v164_v26, 1  ;;  %v179_v39 = vrot.slane %v178_v27, 1 }
   0xd   :  { %v128_v36 = vrot.slane %v127_v34, 1  ;;  %v141_v37 = vld [vmem:[#allocation0 + $0x4f] ss:$-1 sm:$0xff]  ;;  %v155_v38 = vld [vmem:[#allocation0 + $0x5f] ss:$-1 sm:$0xff]  ;;  %90 = vst.msk [vmem:[#allocation1] sm:$0xff] %vm89_vm0, %v86_v31 }
   0xe   :  { %104 = vst.msk [vmem:[#allocation1 + $0x8] sm:$0xff] %vm89_vm0, %v100_v32  ;;  %118 = vst.msk [vmem:[#allocation1 + $0x10] sm:$0xff] %vm89_vm0, %v114_v33  ;;  %v142_v40 = vrot.slane %v141_v37, 1  ;;  %v156_v41 = vrot.slane %v155_v38, 1  ;;  %v169_v42 = vld [vmem:[#allocation0 + $0x6f] ss:$-1 sm:$0xff] }
   0xf   :  { %166 = vst [vmem:[#allocation1 + $0x30] sm:$0xff] %v165_v35  ;;  %v183_v43 = vld [vmem:[#allocation0 + $0x7f] ss:$-1 sm:$0xff]  ;;  %132 = vst.msk [vmem:[#allocation1 + $0x18] sm:$0xff] %vm89_vm0, %v128_v36  ;;  %v170_v44 = vrot.slane %v169_v42, 1 }
  0x10   :  { %180 = vst [vmem:[#allocation1 + $0x38] sm:$0xff] %v179_v39  ;;  %v184_v45 = vrot.slane %v183_v43, 1  ;;  %v192_v46 = vld [vmem:[#allocation0 + $0x87] ss:$-1 sm:$0xff]  ;;  %v197_v47 = vld [vmem:[#allocation0 + $0x8f] ss:$-1 sm:$0xff] }
  0x11   :  { %146 = vst.msk [vmem:[#allocation1 + $0x20] sm:$0xff] %vm89_vm0, %v142_v40  ;;  %160 = vst.msk [vmem:[#allocation1 + $0x28] sm:$0xff] %vm89_vm0, %v156_v41  ;;  %v193_v48 = vrot.slane %v192_v46, 1  ;;  %v198_v49 = vrot.slane %v197_v47, 1  ;;  %v206_v50 = vld [vmem:[#allocation0 + $0x97] ss:$-1 sm:$0xff] }
  0x12   :  { %v211_v51 = vld [vmem:[#allocation0 + $0x9f] ss:$-1 sm:$0xff]  ;;  %174 = vst.msk [vmem:[#allocation1 + $0x30] sm:$0xff] %vm89_vm0, %v170_v44  ;;  %188 = vst.msk [vmem:[#allocation1 + $0x38] sm:$0xff] %vm89_vm0, %v184_v45  ;;  %v207_v52 = vrot.slane %v206_v50, 1 }
  0x13   :  { %v212_v53 = vrot.slane %v211_v51, 1  ;;  %v220_v54 = vld [vmem:[#allocation0 + $0xa7] ss:$-1 sm:$0xff]  ;;  %v225_v55 = vld [vmem:[#allocation0 + $0xaf] ss:$-1 sm:$0xff]  ;;  %194 = vst [vmem:[#allocation1 + $0x40] sm:$0xff] %v193_v48 }
  0x14   :  { %v221_v56 = vrot.slane %v220_v54, 1  ;;  %v226_v57 = vrot.slane %v225_v55, 1  ;;  %v234_v58 = vld [vmem:[#allocation0 + $0xb7] ss:$-1 sm:$0xff]  ;;  %v239_v59 = vld [vmem:[#allocation0 + $0xbf] ss:$-1 sm:$0xff] }
  0x15   :  { %202 = vst.msk [vmem:[#allocation1 + $0x40] sm:$0xff] %vm89_vm0, %v198_v49  ;;  %208 = vst [vmem:[#allocation1 + $0x48] sm:$0xff] %v207_v52  ;;  %v235_v60 = vrot.slane %v234_v58, 1  ;;  %v240_v61 = vrot.slane %v239_v59, 1  ;;  %v294_v62 = vld [vmem:[#allocation1] sm:$0xff]  ;;  %v296_v63 = vld [vmem:[#allocation1 + $0x8] sm:$0xff] }
  0x16   :  { %216 = vst.msk [vmem:[#allocation1 + $0x48] sm:$0xff] %vm89_vm0, %v212_v53  ;;  %222 = vst [vmem:[#allocation1 + $0x50] sm:$0xff] %v221_v56  ;;  %v298_v0 = vld [vmem:[#allocation1 + $0x10] sm:$0xff]  ;;  %v300_v1 = vld [vmem:[#allocation1 + $0x18] sm:$0xff] }
  0x17   :  { %230 = vst.msk [vmem:[#allocation1 + $0x50] sm:$0xff] %vm89_vm0, %v226_v57  ;;  %236 = vst [vmem:[#allocation1 + $0x58] sm:$0xff] %v235_v60 }
  0x18   :  { %244 = vst.msk [vmem:[#allocation1 + $0x58] sm:$0xff] %vm89_vm0, %v240_v61  ;;  %295 = vst [vmem:[%s473_s1] sm:$0xff] %v294_v62  ;;  %v302_v2 = vld [vmem:[#allocation1 + $0x20] sm:$0xff]  ;;  %v304_v3 = vld [vmem:[#allocation1 + $0x28] sm:$0xff] }
  0x19   :  { %297 = vst [vmem:[%s473_s1 + $0x8] sm:$0xff] %v296_v63  ;;  %299 = vst [vmem:[%s473_s1 + $0x10] sm:$0xff] %v298_v0  ;;  %v306_v4 = vld [vmem:[#allocation1 + $0x30] sm:$0xff]  ;;  %v308_v5 = vld [vmem:[#allocation1 + $0x38] sm:$0xff] }
  0x1a   :  { %301 = vst [vmem:[%s473_s1 + $0x18] sm:$0xff] %v300_v1  ;;  %303 = vst [vmem:[%s473_s1 + $0x20] sm:$0xff] %v302_v2 }
  0x1b   :  { %305 = vst [vmem:[%s473_s1 + $0x28] sm:$0xff] %v304_v3  ;;  %307 = vst [vmem:[%s473_s1 + $0x30] sm:$0xff] %v306_v4 }
  0x1c   :  { %309 = vst [vmem:[%s473_s1 + $0x38] sm:$0xff] %v308_v5  ;;  %v310_v6 = vld [vmem:[#allocation1 + $0x40] sm:$0xff] }
  0x1d   :  { %311 = vst [vmem:[%s473_s1 + $0x40] sm:$0xff] %v310_v6  ;;  %v312_v7 = vld [vmem:[#allocation1 + $0x48] sm:$0xff] }
  0x1e   :  { %313 = vst [vmem:[%s473_s1 + $0x48] sm:$0xff] %v312_v7  ;;  %v314_v8 = vld [vmem:[#allocation1 + $0x50] sm:$0xff] }
  0x1f   :  { %315 = vst [vmem:[%s473_s1 + $0x50] sm:$0xff] %v314_v8  ;;  %v316_v9 = vld [vmem:[#allocation1 + $0x58] sm:$0xff] }
  0x20   :  { %317 = vst [vmem:[%s473_s1 + $0x58] sm:$0xff] %v316_v9 }

</bundles_post_ra>
